<compile_context>
chip_gen: v5e
topology: v5e:2x2
jax: 0.10.0
libtpu: 0.0.40
codegen_flags: <defaults>
</compile_context>

<pallas_src>
import functools

import jax
import jax.numpy as jnp
from jax.experimental import pallas as pl
from jax.experimental.pallas import tpu as pltpu

LANE = 128          # lane width for the padded output
MAX_TILE_B = 1024   # batch-tile upper bound; weights (~112 KB) + 2x(x,out)
                    # double-buffers stay far below even v7x's 64 MiB VMEM


def dqn_kernel(x_ref,
               w1_ref, b1_ref,
               w2_ref, b2_ref,
               w3_ref, b3_ref,
               w4_ref, b4_ref,
               out_ref):
    # In-kernel f32 -> bf16 cast of x; all matmuls accumulate in f32 on the MXU,
    # bias-add + ReLU done in f32 (VPU), inter-layer activations in bf16.
    h = x_ref[...].astype(jnp.bfloat16)
    h = jnp.dot(h, w1_ref[...], preferred_element_type=jnp.float32)
    h = jnp.maximum(h + b1_ref[...], 0.0).astype(jnp.bfloat16)
    h = jnp.dot(h, w2_ref[...], preferred_element_type=jnp.float32)
    h = jnp.maximum(h + b2_ref[...], 0.0).astype(jnp.bfloat16)
    h = jnp.dot(h, w3_ref[...], preferred_element_type=jnp.float32)
    h = jnp.maximum(h + b3_ref[...], 0.0).astype(jnp.bfloat16)
    # layer4 (no activation); output lane-padded to 128 -> full unmasked store.
    o = jnp.dot(h, w4_ref[...], preferred_element_type=jnp.float32)
    out_ref[...] = (o + b4_ref[...]).astype(out_ref.dtype)


def _pick_tile_b(batch):
    """Largest batch tile (multiple of 128, <= MAX_TILE_B) that keeps
    grid_b >= 2 whenever the batch allows it (keeps both v7x TCs busy)."""
    b128 = pl.cdiv(batch, 128) * 128
    if b128 <= 128:
        return 128
    half = (b128 // 2) // 128 * 128
    return max(128, min(MAX_TILE_B, half))


@functools.partial(jax.jit, static_argnames=("n_actions", "tile_b"))
def dqn_forward(x, params, *, n_actions, tile_b=None):
    """Fused DQN forward. x: (B, n_observations + 14) f32. Returns (B, n_actions) f32."""
    (w1, b1), (w2, b2), (w3, b3), (w4, b4) = params
    B, in_dim = x.shape
    n_pad = w4.shape[1]                      # lane-padded output width (128)

    if tile_b is None:
        tile_b = _pick_tile_b(B)
    grid_b = pl.cdiv(B, tile_b)
    b_pad = grid_b * tile_b

    if b_pad != B:
        # TODO(synk): pad upstream / handle the ragged last tile to avoid this copy.
        x = jnp.pad(x, ((0, b_pad - B), (0, 0)))

    x_map = lambda i: (i, 0)                 # batch-tiled
    w_map = lambda i: (0, 0)                 # VMEM-resident across grid steps

    layer_dims = [w1.shape, w2.shape, w3.shape, w4.shape]
    flops = 2 * b_pad * sum(int(a) * int(b) for a, b in layer_dims)
    bytes_accessed = (x.size * x.dtype.itemsize
                      + b_pad * n_pad * 2     # bf16 output writeback
                      + sum(w.size * w.dtype.itemsize + b.size * b.dtype.itemsize
                            for w, b in params))

    out_padded = pl.pallas_call(
        dqn_kernel,
        out_shape=jax.ShapeDtypeStruct((b_pad, n_pad), jnp.bfloat16),
        grid=(grid_b,),
        in_specs=[
            pl.BlockSpec((tile_b, in_dim), x_map),
            pl.BlockSpec(w1.shape, w_map), pl.BlockSpec(b1.shape, w_map),
            pl.BlockSpec(w2.shape, w_map), pl.BlockSpec(b2.shape, w_map),
            pl.BlockSpec(w3.shape, w_map), pl.BlockSpec(b3.shape, w_map),
            pl.BlockSpec(w4.shape, w_map), pl.BlockSpec(b4.shape, w_map),
        ],
        out_specs=pl.BlockSpec((tile_b, n_pad), x_map),
        compiler_params=pltpu.CompilerParams(
            dimension_semantics=("parallel",)),
        cost_estimate=pl.CostEstimate(
            flops=flops, transcendentals=0, bytes_accessed=bytes_accessed),
    )(x, w1, b1, w2, b2, w3, b3, w4, b4)

    return out_padded[:B, :n_actions].astype(jnp.float32)


def init_linear(key, fan_in, fan_out, *, pad_out=None):
    """PyTorch nn.Linear-style init (uniform +/- 1/sqrt(fan_in)).

    Weight stored transposed to (fan_in, fan_out) in bf16; bias is (1, fan_out)
    in f32. If pad_out is given, weight/bias are zero-padded to pad_out lanes."""
    kw, kb = jax.random.split(key)
    bound = 1.0 / jnp.sqrt(jnp.float32(fan_in))
    w = jax.random.uniform(kw, (fan_in, fan_out), jnp.float32, -bound, bound)
    b = jax.random.uniform(kb, (1, fan_out), jnp.float32, -bound, bound)
    if pad_out is not None and pad_out > fan_out:
        w = jnp.pad(w, ((0, 0), (0, pad_out - fan_out)))
        b = jnp.pad(b, ((0, 0), (0, pad_out - fan_out)))
    return w.astype(jnp.bfloat16), b.astype(jnp.float32)


def init_dqn_params(key, n_observations, n_actions):
    in_dim = n_observations + 14
    k1, k2, k3, k4 = jax.random.split(key, 4)
    n_pad = max(LANE, pl.cdiv(n_actions, LANE) * LANE)
    return (
        init_linear(k1, in_dim, 256),
        init_linear(k2, 256, 128),
        init_linear(k3, 128, 64),
        init_linear(k4, 64, n_actions, pad_out=n_pad),   # lane-dense output
    )


def dqn_reference(x, params):
    """Plain-JAX reference using the same bf16-operand / f32-accumulate recipe."""
    (w1, b1), (w2, b2), (w3, b3), (w4, b4) = params
    h = x.astype(jnp.bfloat16)
    h = jnp.maximum(jnp.dot(h, w1, preferred_element_type=jnp.float32) + b1,
                    0.0).astype(jnp.bfloat16)
    h = jnp.maximum(jnp.dot(h, w2, preferred_element_type=jnp.float32) + b2,
                    0.0).astype(jnp.bfloat16)
    h = jnp.maximum(jnp.dot(h, w3, preferred_element_type=jnp.float32) + b3,
                    0.0).astype(jnp.bfloat16)
    return jnp.dot(h, w4, preferred_element_type=jnp.float32) + b4


if __name__ == "__main__":
    key = jax.random.PRNGKey(0)
    k_params, k_x = jax.random.split(key)

    n_observations = 18    # -> layer1 input dim = 18 + 14 = 32
    n_actions = 4
    batch = 256            # -> tile_b=128, grid_b=2: exercises grid + dual-TC parallel

    params = init_dqn_params(k_params, n_observations, n_actions)
    x = jax.random.normal(k_x, (batch, n_observations + 14), jnp.float32)

    out = dqn_forward(x, params, n_actions=n_actions)
    out = jax.block_until_ready(out)

    ref = dqn_reference(x, params)[:, :n_actions]
    assert out.shape == (batch, n_actions), out.shape
    assert jnp.allclose(out, ref, atol=2e-2, rtol=2e-2), "mismatch vs reference"

    print("KERNEL_OK")
</pallas_src>

<mosaic_0001>
module attributes {stable_mosaic.version = 11 : i64} {
  func.func @dqn_kernel(%arg0: i32, %arg1: memref<128x32xf32, #tpu.memory_space<vmem>>, %arg2: memref<32x256xbf16, #tpu.memory_space<vmem>>, %arg3: memref<1x256xf32, #tpu.memory_space<vmem>>, %arg4: memref<256x128xbf16, #tpu.memory_space<vmem>>, %arg5: memref<1x128xf32, #tpu.memory_space<vmem>>, %arg6: memref<128x64xbf16, #tpu.memory_space<vmem>>, %arg7: memref<1x64xf32, #tpu.memory_space<vmem>>, %arg8: memref<64x128xbf16, #tpu.memory_space<vmem>>, %arg9: memref<1x128xf32, #tpu.memory_space<vmem>>, %arg10: memref<128x128xbf16, #tpu.memory_space<vmem>>) attributes {dimension_semantics = [#tpu.dimension_semantics<parallel>], iteration_bounds = array<i64: 2>, scalar_prefetch = 0 : i64, scratch_operands = 0 : i64, tpu.core_type = #tpu.core_type<tc>, window_params = [{transform_indices = @transform_0, window_bounds = array<i64: 128, 32>}, {pipeline_mode = #tpu.pipeline_mode<synchronous>, transform_indices = @transform_1, window_bounds = array<i64: 32, 256>}, {pipeline_mode = #tpu.pipeline_mode<synchronous>, transform_indices = @transform_2, window_bounds = array<i64: 1, 256>}, {pipeline_mode = #tpu.pipeline_mode<synchronous>, transform_indices = @transform_3, window_bounds = array<i64: 256, 128>}, {pipeline_mode = #tpu.pipeline_mode<synchronous>, transform_indices = @transform_4, window_bounds = array<i64: 1, 128>}, {pipeline_mode = #tpu.pipeline_mode<synchronous>, transform_indices = @transform_5, window_bounds = array<i64: 128, 64>}, {pipeline_mode = #tpu.pipeline_mode<synchronous>, transform_indices = @transform_6, window_bounds = array<i64: 1, 64>}, {pipeline_mode = #tpu.pipeline_mode<synchronous>, transform_indices = @transform_7, window_bounds = array<i64: 64, 128>}, {pipeline_mode = #tpu.pipeline_mode<synchronous>, transform_indices = @transform_8, window_bounds = array<i64: 1, 128>}, {transform_indices = @transform_9, window_bounds = array<i64: 128, 128>}]} {
    %c0 = arith.constant 0 : index
    %c0_0 = arith.constant 0 : index
    %0 = vector.load %arg1[%c0, %c0_0] : memref<128x32xf32, #tpu.memory_space<vmem>>, vector<128x32xf32>
    %1 = arith.truncf %0 : vector<128x32xf32> to vector<128x32xbf16>
    %c0_1 = arith.constant 0 : index
    %c0_2 = arith.constant 0 : index
    %2 = vector.load %arg2[%c0_1, %c0_2] : memref<32x256xbf16, #tpu.memory_space<vmem>>, vector<32x256xbf16>
    %cst = arith.constant dense<0.000000e+00> : vector<128x256xf32>
    %3 = tpu.matmul %1, %2, %cst {dimension_numbers = #tpu.dot_dimension_numbers<[1], [0], [0], [1], [0, 0, 1, 1], [], []>} : vector<128x32xbf16>, vector<32x256xbf16>, vector<128x256xf32> -> vector<128x256xf32>
    %c0_3 = arith.constant 0 : index
    %c0_4 = arith.constant 0 : index
    %4 = vector.load %arg3[%c0_3, %c0_4] : memref<1x256xf32, #tpu.memory_space<vmem>>, vector<1x256xf32>
    %5 = vector.broadcast %4 : vector<1x256xf32> to vector<128x256xf32>
    %6 = arith.addf %3, %5 : vector<128x256xf32>
    %cst_5 = arith.constant 0.000000e+00 : f32
    %7 = vector.broadcast %cst_5 : f32 to vector<128x256xf32>
    %8 = arith.maximumf %6, %7 : vector<128x256xf32>
    %9 = arith.truncf %8 : vector<128x256xf32> to vector<128x256xbf16>
    %c0_6 = arith.constant 0 : index
    %c0_7 = arith.constant 0 : index
    %10 = vector.load %arg4[%c0_6, %c0_7] : memref<256x128xbf16, #tpu.memory_space<vmem>>, vector<256x128xbf16>
    %cst_8 = arith.constant dense<0.000000e+00> : vector<128x128xf32>
    %11 = tpu.matmul %9, %10, %cst_8 {dimension_numbers = #tpu.dot_dimension_numbers<[1], [0], [0], [1], [0, 0, 1, 1], [], []>} : vector<128x256xbf16>, vector<256x128xbf16>, vector<128x128xf32> -> vector<128x128xf32>
    %c0_9 = arith.constant 0 : index
    %c0_10 = arith.constant 0 : index
    %12 = vector.load %arg5[%c0_9, %c0_10] : memref<1x128xf32, #tpu.memory_space<vmem>>, vector<1x128xf32>
    %13 = vector.broadcast %12 : vector<1x128xf32> to vector<128x128xf32>
    %14 = arith.addf %11, %13 : vector<128x128xf32>
    %cst_11 = arith.constant 0.000000e+00 : f32
    %15 = vector.broadcast %cst_11 : f32 to vector<128x128xf32>
    %16 = arith.maximumf %14, %15 : vector<128x128xf32>
    %17 = arith.truncf %16 : vector<128x128xf32> to vector<128x128xbf16>
    %c0_12 = arith.constant 0 : index
    %c0_13 = arith.constant 0 : index
    %18 = vector.load %arg6[%c0_12, %c0_13] : memref<128x64xbf16, #tpu.memory_space<vmem>>, vector<128x64xbf16>
    %cst_14 = arith.constant dense<0.000000e+00> : vector<128x64xf32>
    %19 = tpu.matmul %17, %18, %cst_14 {dimension_numbers = #tpu.dot_dimension_numbers<[1], [0], [0], [1], [0, 0, 1, 1], [], []>} : vector<128x128xbf16>, vector<128x64xbf16>, vector<128x64xf32> -> vector<128x64xf32>
    %c0_15 = arith.constant 0 : index
    %c0_16 = arith.constant 0 : index
    %20 = vector.load %arg7[%c0_15, %c0_16] : memref<1x64xf32, #tpu.memory_space<vmem>>, vector<1x64xf32>
    %21 = vector.broadcast %20 : vector<1x64xf32> to vector<128x64xf32>
    %22 = arith.addf %19, %21 : vector<128x64xf32>
    %cst_17 = arith.constant 0.000000e+00 : f32
    %23 = vector.broadcast %cst_17 : f32 to vector<128x64xf32>
    %24 = arith.maximumf %22, %23 : vector<128x64xf32>
    %25 = arith.truncf %24 : vector<128x64xf32> to vector<128x64xbf16>
    %c0_18 = arith.constant 0 : index
    %c0_19 = arith.constant 0 : index
    %26 = vector.load %arg8[%c0_18, %c0_19] : memref<64x128xbf16, #tpu.memory_space<vmem>>, vector<64x128xbf16>
    %cst_20 = arith.constant dense<0.000000e+00> : vector<128x128xf32>
    %27 = tpu.matmul %25, %26, %cst_20 {dimension_numbers = #tpu.dot_dimension_numbers<[1], [0], [0], [1], [0, 0, 1, 1], [], []>} : vector<128x64xbf16>, vector<64x128xbf16>, vector<128x128xf32> -> vector<128x128xf32>
    %c0_21 = arith.constant 0 : index
    %c0_22 = arith.constant 0 : index
    %28 = vector.load %arg9[%c0_21, %c0_22] : memref<1x128xf32, #tpu.memory_space<vmem>>, vector<1x128xf32>
    %29 = vector.broadcast %28 : vector<1x128xf32> to vector<128x128xf32>
    %30 = arith.addf %27, %29 : vector<128x128xf32>
    %31 = arith.truncf %30 : vector<128x128xf32> to vector<128x128xbf16>
    %c0_23 = arith.constant 0 : index
    %c0_24 = arith.constant 0 : index
    %32 = vector.load %arg10[%c0_23, %c0_24] : memref<128x128xbf16, #tpu.memory_space<vmem>>, vector<128x128xbf16>
    tpu.vector_store %arg10[%c0_23, %c0_24], %31 {strides = array<i32>} : memref<128x128xbf16, #tpu.memory_space<vmem>>, vector<128x128xbf16>,
    return
  }
  func.func @transform_0(%arg0: i32) -> (i32, i32) {
    %c0_i32 = arith.constant 0 : i32
    %c0_i32_0 = arith.constant 0 : i32
    return %arg0, %c0_i32 : i32, i32
  }
  func.func @transform_1(%arg0: i32) -> (i32, i32) {
    %c0_i32 = arith.constant 0 : i32
    %c0_i32_0 = arith.constant 0 : i32
    %c0_i32_1 = arith.constant 0 : i32
    return %c0_i32, %c0_i32_0 : i32, i32
  }
  func.func @transform_2(%arg0: i32) -> (i32, i32) {
    %c0_i32 = arith.constant 0 : i32
    %c0_i32_0 = arith.constant 0 : i32
    %c0_i32_1 = arith.constant 0 : i32
    return %c0_i32, %c0_i32_0 : i32, i32
  }
  func.func @transform_3(%arg0: i32) -> (i32, i32) {
    %c0_i32 = arith.constant 0 : i32
    %c0_i32_0 = arith.constant 0 : i32
    %c0_i32_1 = arith.constant 0 : i32
    return %c0_i32, %c0_i32_0 : i32, i32
  }
  func.func @transform_4(%arg0: i32) -> (i32, i32) {
    %c0_i32 = arith.constant 0 : i32
    %c0_i32_0 = arith.constant 0 : i32
    %c0_i32_1 = arith.constant 0 : i32
    return %c0_i32, %c0_i32_0 : i32, i32
  }
  func.func @transform_5(%arg0: i32) -> (i32, i32) {
    %c0_i32 = arith.constant 0 : i32
    %c0_i32_0 = arith.constant 0 : i32
    %c0_i32_1 = arith.constant 0 : i32
    return %c0_i32, %c0_i32_0 : i32, i32
  }
  func.func @transform_6(%arg0: i32) -> (i32, i32) {
    %c0_i32 = arith.constant 0 : i32
    %c0_i32_0 = arith.constant 0 : i32
    %c0_i32_1 = arith.constant 0 : i32
    return %c0_i32, %c0_i32_0 : i32, i32
  }
  func.func @transform_7(%arg0: i32) -> (i32, i32) {
    %c0_i32 = arith.constant 0 : i32
    %c0_i32_0 = arith.constant 0 : i32
    %c0_i32_1 = arith.constant 0 : i32
    return %c0_i32, %c0_i32_0 : i32, i32
  }
  func.func @transform_8(%arg0: i32) -> (i32, i32) {
    %c0_i32 = arith.constant 0 : i32
    %c0_i32_0 = arith.constant 0 : i32
    %c0_i32_1 = arith.constant 0 : i32
    return %c0_i32, %c0_i32_0 : i32, i32
  }
  func.func @transform_9(%arg0: i32) -> (i32, i32) {
    %c0_i32 = arith.constant 0 : i32
    %c0_i32_0 = arith.constant 0 : i32
    return %arg0, %c0_i32 : i32, i32
  }
}

</mosaic_0001>

<bundles_post_ra>
// kernel: dqn_forward.1
= control target key start
LH: loop header
LB: loop body
LE: loop exit
PB: predicated region body
PF: predicated region fallthrough
CT: control target
= control target key end

     0   :  { %s1478_s30 = smov 0   ;;  %s1725_s0 = inlined_call_operand.vmem [shape: f32[256,32], index: 0, kind: input, shape index: {}]   ;;  %s1726_s1 = inlined_call_operand.vmem [shape: bf16[32,256], index: 1, kind: input, shape index: {}]   ;;  %s1727_s2 = inlined_call_operand.vmem [shape: f32[1,256], index: 2, kind: input, shape index: {}]   ;;  %s1728_s3 = inlined_call_operand.vmem [shape: bf16[256,128], index: 3, kind: input, shape index: {}]   ;;  %s1729_s4 = inlined_call_operand.vmem [shape: f32[1,128], index: 4, kind: input, shape index: {}]   ;;  %s1730_s5 = inlined_call_operand.vmem [shape: bf16[128,64], index: 5, kind: input, shape index: {}]   ;;  %s1731_s6 = inlined_call_operand.vmem [shape: f32[1,64], index: 6, kind: input, shape index: {}]   ;;  %s1732_s7 = inlined_call_operand.vmem [shape: bf16[64,128], index: 7, kind: input, shape index: {}]   ;;  %s1733_s8 = inlined_call_operand.vmem [shape: f32[1,128], index: 8, kind: input, shape index: {}]   ;;  %s1734_s9 = inlined_call_operand.vmem [shape: bf16[256,128], index: 9, kind: output, shape index: {}]  }
   0x1 LB: > { %s1155_s10 = sadd.s32 4294967295, %s1426_s30   ;;  %p1159_p0 = scmp.ge.s32.totalorder %s1426_s30, 1  ;;  %s1426_s30 = sphi %s1478_s30, %s19_s30  }
   0x2   : > { %p288_p1 = scmp.lt.s32.totalorder %s1426_s30, 3 }
   0x4   : > { %p289_p2 = pnand %p1159_p0, %p288_p1 }
   0x5   : > { %s1160_s27 = sshll.u32 (!%p289_p2), %s1155_s10, 4 }
   0x6   : > { %292 = sbr.rel (%p289_p2) target bundleno = 706 (0x2c2), region = 56  ;;  %p325_p3 = scmp.lt.s32.totalorder (!%p289_p2), %s1160_s27, 31 }
   0xb   : > { %v1174_v0 = vld [vmem:[%s1726_s1 + $0x10] sm:$0xf]  ;;  %v1321_v1 = vld [vmem:[%s1726_s1 + $0x14] sm:$0xf0]  ;;  %v1320_v2 = vld [vmem:[%s1726_s1 + $0x14] sm:$0xf] }
   0xc   : > { %v1175_v3 = vor.u32 %v1321_v1, %v1174_v0  ;;  %v1176_v4 = vld [vmem:[%s1726_s1 + $0x18] sm:$0xf0]  ;;  %v1166_v5 = vld [vmem:[%s1726_s1] sm:$0xf]  ;;  %v1319_v6 = vld [vmem:[%s1726_s1 + $0x4] sm:$0xf0] }
   0xd   : > { %v1179_v7 = vor.u32 %v1320_v2, %v1176_v4  ;;  %v1318_v8 = vld [vmem:[%s1726_s1 + $0x4] sm:$0xf]  ;;  %v1168_v9 = vld [vmem:[%s1726_s1 + $0x8] sm:$0xf0]  ;;  %v1167_v10 = vor.u32 %v1319_v6, %v1166_v5  ;;  %s1736_s27 = smov (!%p325_p3, %s1160_s27), 31  ;;  %vm391_vm0 = vcmask 261120  }
   0xe   : > { %422 = vmatpush.bf16.msra.mxu0 %v1175_v3  ;;  %1397 = vmatpush.bf16.msra.mxu2 %v1175_v3  ;;  %v1171_v11 = vor.u32 %v1318_v8, %v1168_v9  ;;  %s1161_s28 = sshll.u32 %s1736_s27, 3  ;;  %v1337_v27 = vld [vmem:[%s1728_s3 + $0x78] sm:$0xff]  ;;  %v1336_v29 = vld [vmem:[%s1728_s3 + $0x70] sm:$0xff]  ;;  %v1335_v31 = vld [vmem:[%s1728_s3 + $0x68] sm:$0xff]  ;;  %vm993_vm1 = vcmask 523264   ;;  %s1163_s20 = sshll.u32 %s1736_s27, 2 }
   0xf   : > { %471 = vmatpush.bf16.msra.mxu1 %v1179_v7  ;;  %1399 = vmatpush.bf16.msra.mxu3 %v1179_v7  ;;  %s1516_s12 = scalar_lea.vmem %s1725_s0, %s1161_s28  ;;  %v1329_v28 = vld [vmem:[%s1728_s3 + $0x38] sm:$0xff]  ;;  %v1328_v30 = vld [vmem:[%s1728_s3 + $0x30] sm:$0xff]  ;;  %v1327_v32 = vld [vmem:[%s1728_s3 + $0x28] sm:$0xff]  ;;  %s1712_s23 = scalar_lea.vmem %s1734_s9, %s1163_s20 }
  0x10   : > { %v337_v12 = vld [vmem:[%s1516_s12] sm:$0xff]  ;;  %v338_v13 = vld [vmem:[%s1516_s12 + $0x8] sm:$0xff]  ;;  %v339_v15 = vld [vmem:[%s1516_s12 + $0x10] sm:$0xff] }
  0x11   : > { %v353_v14 = vpack.c.bf16 %v338_v13, %v337_v12  ;;  %v340_v16 = vld [vmem:[%s1516_s12 + $0x18] sm:$0xff]  ;;  %v345_v18 = vld [vmem:[%s1516_s12 + $0x40] sm:$0xff]  ;;  %v346_v19 = vld [vmem:[%s1516_s12 + $0x48] sm:$0xff] }
  0x12   : > { %423 = vmatpush.bf16.msra.mxu0 %v1167_v10  ;;  %1398 = vmatpush.bf16.msra.mxu2 %v1167_v10  ;;  %v354_v17 = vpack.c.bf16 %v340_v16, %v339_v15  ;;  %v357_v20 = vpack.c.bf16 %v346_v19, %v345_v18  ;;  %v341_v21 = vld [vmem:[%s1516_s12 + $0x20] sm:$0xff]  ;;  %v342_v22 = vld [vmem:[%s1516_s12 + $0x28] sm:$0xff]  ;;  %v347_v24 = vld [vmem:[%s1516_s12 + $0x50] sm:$0xff] }
  0x13   : > { %472 = vmatpush.bf16.msra.mxu1 %v1171_v11  ;;  %1400 = vmatpush.bf16.msra.mxu3 %v1171_v11  ;;  %v355_v23 = vpack.c.bf16 %v342_v22, %v341_v21  ;;  %v348_v25 = vld [vmem:[%s1516_s12 + $0x58] sm:$0xff]  ;;  %v343_v33 = vld [vmem:[%s1516_s12 + $0x30] sm:$0xff]  ;;  %v1334_v35 = vld [vmem:[%s1728_s3 + $0x60] sm:$0xff] }
  0x14   : > { %v358_v26 = vpack.c.bf16 %v348_v25, %v347_v24  ;;  %v344_v34 = vld [vmem:[%s1516_s12 + $0x38] sm:$0xff]  ;;  %v349_v36 = vld [vmem:[%s1516_s12 + $0x60] sm:$0xff]  ;;  %v350_v37 = vld [vmem:[%s1516_s12 + $0x68] sm:$0xff] }
  0x15   : > { %1180 = vmatmul.msk.bf16.vlgmr.msra.gmra.mxu0 %vm391_vm0, %v353_v14  ;;  %v1326_v38 = vld [vmem:[%s1728_s3 + $0x20] sm:$0xff]  ;;  %v356_v39 = vpack.c.bf16 %v344_v34, %v343_v33  ;;  %v359_v40 = vpack.c.bf16 %v350_v37, %v349_v36  ;;  %v1333_v41 = vld [vmem:[%s1728_s3 + $0x58] sm:$0xff]  ;;  %v1332_v43 = vld [vmem:[%s1728_s3 + $0x50] sm:$0xff] }
  0x16   : > { %1188 = vmatmul.msk.bf16.vlgmr.msra.gmra.mxu1 %vm391_vm0, %v353_v14  ;;  %1192 = vmatmul.msk.bf16.vlgmr.msra.gmra.mxu3 %vm391_vm0, %v357_v20  ;;  %v1325_v42 = vld [vmem:[%s1728_s3 + $0x18] sm:$0xff]  ;;  %v1324_v44 = vld [vmem:[%s1728_s3 + $0x10] sm:$0xff]  ;;  %v1331_v48 = vld [vmem:[%s1728_s3 + $0x48] sm:$0xff] }
  0x17   : > { %1185 = vmatmul.msk.bf16.vlgmr.msra.gmra.mxu2 %vm391_vm0, %v358_v26  ;;  %743 = vmatpush.bf16.msrb.mxu3 %v1337_v27  ;;  %v351_v45 = vld [vmem:[%s1516_s12 + $0x70] sm:$0xff]  ;;  %v352_v46 = vld [vmem:[%s1516_s12 + $0x78] sm:$0xff]  ;;  %v1323_v49 = vld [vmem:[%s1728_s3 + $0x8] sm:$0xff] }
  0x18   : > { %694 = vmatpush.bf16.msrb.mxu2 %v1329_v28  ;;  %v360_v47 = vpack.c.bf16 %v352_v46, %v351_v45  ;;  %v1322_v50 = vld [vmem:[%s1728_s3] sm:$0xff]  ;;  %v1345_v34 = vld [vmem:[%s1730_s5 + $0x38] sm:$0xff] }
  0x19   : > { %v1330_v51 = vld [vmem:[%s1728_s3 + $0x40] sm:$0xff]  ;;  %884 = vmatpush.bf16.msrb.mxu0 %v1345_v34 }
  0x1a   : > { %v365_v52 = vld [vmem:[%s1727_s2] sm:$0x3] }
  0x1b   : > { %744 = vmatpush.bf16.msrb.mxu3 %v1336_v29  ;;  %v1601_v55 = vperm.slane %v365_v52, 0  ;;  %v1603_v56 = vperm.slane %v365_v52, 1 }
  0x1c   : > { %695 = vmatpush.bf16.msrb.mxu2 %v1328_v30 }
  0x1f   : > { %745 = vmatpush.bf16.msrb.mxu3 %v1335_v31 }
  0x20   : > { %696 = vmatpush.bf16.msrb.mxu2 %v1327_v32 }
  0x23   : > { %746 = vmatpush.bf16.msrb.mxu3 %v1334_v35 }
  0x24   : > { %697 = vmatpush.bf16.msrb.mxu2 %v1326_v38 }
  0x25   : > { %1181 = vmatmul.msk.bf16.gmra.mxu0 %vm391_vm0, %v354_v17 }
  0x26   : > { %1189 = vmatmul.msk.bf16.gmra.mxu1 %vm391_vm0, %v354_v17  ;;  %1193 = vmatmul.msk.bf16.gmra.mxu3 %vm391_vm0, %v358_v26 }
  0x27   : > { %1186 = vmatmul.msk.bf16.gmra.mxu2 %vm391_vm0, %v359_v40  ;;  %747 = vmatpush.bf16.msrb.mxu3 %v1333_v41 }
  0x28   : > { %698 = vmatpush.bf16.msrb.mxu2 %v1325_v42 }
  0x2b   : > { %748 = vmatpush.bf16.msrb.mxu3 %v1332_v43 }
  0x2c   : > { %699 = vmatpush.bf16.msrb.mxu2 %v1324_v44 }
  0x2f   : > { %749 = vmatpush.bf16.msrb.mxu3 %v1331_v48 }
  0x30   : > { %700 = vmatpush.bf16.msrb.mxu2 %v1323_v49 }
  0x33   : > { %750 = vmatpush.bf16.msrb.mxu3 %v1330_v51  ;;  %v1344_v51 = vld [vmem:[%s1730_s5 + $0x30] sm:$0xff] }
  0x34   : > { %701 = vmatpush.bf16.msrb.mxu2 %v1322_v50  ;;  %885 = vmatpush.bf16.msrb.mxu0 %v1344_v51 }
  0x35   : > { %1182 = vmatmul.msk.bf16.gmra.mxu0 %vm391_vm0, %v355_v23 }
  0x36   : > { %1190 = vmatmul.msk.bf16.gmra.mxu1 %vm391_vm0, %v355_v23  ;;  %1194 = vmatmul.msk.bf16.gmra.mxu3 %vm391_vm0, %v359_v40 }
  0x37   : > { %1187 = vmatmul.msk.bf16.gmra.mxu2 %vm391_vm0, %v360_v47 }
  0x38   : > { %1401 = vmatpush.bf16.msra.mxu2 %v1345_v34 }
  0x3c   : > { %1402 = vmatpush.bf16.msra.mxu2 %v1344_v51 }
  0x45   : > { %1183 = vmatmul.msk.bf16.gmra.mxu0 %vm391_vm0, %v356_v39 }
  0x46   : > { %1191 = vmatmul.msk.bf16.gmra.mxu1 %vm391_vm0, %v356_v39  ;;  %1195 = vmatmul.msk.bf16.gmra.mxu3 %vm391_vm0, %v360_v47 }
  0x55   : > { %1184 = vmatmul.msk.bf16.gmra.mxu0 %vm391_vm0, %v357_v20 }
  0x92   : > { %v425_v53 = vpop.f32.mrf.mxu0 }
  0x93   : > { %v474_v54 = vpop.f32.mrf.mxu1  ;;  %v426_v57 = vadd.f32 %v425_v53, %v1601_v55 }
  0x94   : > { %v475_v58 = vadd.f32 %v474_v54, %v1603_v56  ;;  %v1343_v54 = vld [vmem:[%s1730_s5 + $0x28] sm:$0xff] }
  0x95   : > { %v514_v63 = vmax.f32 %v426_v57, 0.0  ;;  %886 = vmatpush.bf16.msrb.mxu0 %v1343_v54  ;;  %1403 = vmatpush.bf16.msra.mxu2 %v1343_v54 }
  0x96   : > { %v515_v0 = vmax.f32 %v475_v58, 0.0 }
  0x99   : > { %v494_v31 = vpop.f32.mrf.mxu3 }
  0x9a   : > { %v427_v59 = vpop.f32.mrf.mxu0  ;;  %v450_v50 = vpop.f32.mrf.mxu2  ;;  %v495_v57 = vadd.f32 %v494_v31, %v1603_v56 }
  0x9b   : > { %v476_v60 = vpop.f32.mrf.mxu1  ;;  %v428_v61 = vadd.f32 %v427_v59, %v1601_v55 }
  0x9c   : > { %v477_v62 = vadd.f32 %v476_v60, %v1603_v56 }
  0x9d   : > { %v516_v1 = vmax.f32 %v428_v61, 0.0  ;;  %v531_v61 = vmax.f32 %v495_v57, 0.0 }
  0x9e   : > { %v517_v2 = vmax.f32 %v477_v62, 0.0 }
  0x9f   : > { %v546_v3 = vpack.c.bf16 %v516_v1, %v514_v63 }
  0xa0   : > { %v547_v4 = vpack.c.bf16 %v517_v2, %v515_v0 }
  0xa1   : > { %702 = vmatmul.bf16.vlgmr.msrb.gmra.mxu2 %v546_v3  ;;  %v496_v37 = vpop.f32.mrf.mxu3 }
  0xa2   : > { %751 = vmatmul.bf16.vlgmr.msrb.gmra.mxu3 %v547_v4  ;;  %v430_v5 = vpop.f32.mrf.mxu0  ;;  %v497_v58 = vadd.f32 %v496_v37, %v1603_v56  ;;  %v452_v0 = vpop.f32.mrf.mxu2 }
  0xa3   : > { %v479_v6 = vpop.f32.mrf.mxu1  ;;  %v431_v7 = vadd.f32 %v430_v5, %v1601_v55 }
  0xa4   : > { %v480_v8 = vadd.f32 %v479_v6, %v1603_v56  ;;  %v533_v62 = vmax.f32 %v497_v58, 0.0  ;;  %v1342_v6 = vld [vmem:[%s1730_s5 + $0x20] sm:$0xff] }
  0xa5   : > { %v518_v13 = vmax.f32 %v431_v7, 0.0  ;;  %887 = vmatpush.bf16.msrb.mxu0 %v1342_v6  ;;  %1404 = vmatpush.bf16.msra.mxu2 %v1342_v6 }
  0xa6   : > { %v519_v14 = vmax.f32 %v480_v8, 0.0  ;;  %v555_v5 = vpack.c.bf16 %v533_v62, %v531_v61 }
  0xa9   : > { %v499_v53 = vpop.f32.mrf.mxu3 }
  0xaa   : > { %v432_v9 = vpop.f32.mrf.mxu0  ;;  %v455_v7 = vpop.f32.mrf.mxu2 }
  0xab   : > { %v481_v10 = vpop.f32.mrf.mxu1  ;;  %v433_v11 = vadd.f32 %v432_v9, %v1601_v55  ;;  %v451_v9 = vadd.f32 %v450_v50, %v1601_v55 }
  0xac   : > { %v482_v12 = vadd.f32 %v481_v10, %v1603_v56  ;;  %v500_v10 = vadd.f32 %v499_v53, %v1603_v56 }
  0xad   : > { %v520_v15 = vmax.f32 %v433_v11, 0.0  ;;  %v453_v11 = vadd.f32 %v452_v0, %v1601_v55 }
  0xae   : > { %v521_v16 = vmax.f32 %v482_v12, 0.0 }
  0xaf   : > { %v548_v17 = vpack.c.bf16 %v520_v15, %v518_v13  ;;  %v534_v13 = vmax.f32 %v451_v9, 0.0  ;;  %v536_v15 = vmax.f32 %v453_v11, 0.0 }
  0xb0   : > { %v549_v18 = vpack.c.bf16 %v521_v16, %v519_v14  ;;  %v535_v14 = vmax.f32 %v500_v10, 0.0 }
  0xb1   : > { %707 = vmatmul.bf16.gmra.mxu2 %v548_v17  ;;  %v501_v1 = vpop.f32.mrf.mxu3  ;;  %v556_v17 = vpack.c.bf16 %v536_v15, %v534_v13 }
  0xb2   : > { %756 = vmatmul.bf16.gmra.mxu3 %v549_v18  ;;  %v435_v19 = vpop.f32.mrf.mxu0  ;;  %v502_v12 = vadd.f32 %v501_v1, %v1603_v56 }
  0xb3   : > { %v484_v20 = vpop.f32.mrf.mxu1  ;;  %v436_v21 = vadd.f32 %v435_v19, %v1601_v55  ;;  %v457_v19 = vpop.f32.mrf.mxu2 }
  0xb4   : > { %v485_v22 = vadd.f32 %v484_v20, %v1603_v56  ;;  %v537_v16 = vmax.f32 %v502_v12, 0.0 }
  0xb5   : > { %v522_v27 = vmax.f32 %v436_v21, 0.0  ;;  %v1341_v21 = vld [vmem:[%s1730_s5 + $0x18] sm:$0xff] }
  0xb6   : > { %v523_v28 = vmax.f32 %v485_v22, 0.0  ;;  %v557_v18 = vpack.c.bf16 %v537_v16, %v535_v14  ;;  %888 = vmatpush.bf16.msrb.mxu0 %v1341_v21  ;;  %v1340_v22 = vld [vmem:[%s1730_s5 + $0x10] sm:$0xff]  ;;  %1405 = vmatpush.bf16.msra.mxu2 %v1341_v21 }
  0xb9   : > { %v504_v8 = vpop.f32.mrf.mxu3 }
  0xba   : > { %v437_v23 = vpop.f32.mrf.mxu0  ;;  %889 = vmatpush.bf16.msrb.mxu0 %v1340_v22  ;;  %1406 = vmatpush.bf16.msra.mxu2 %v1340_v22 }
  0xbb   : > { %v486_v24 = vpop.f32.mrf.mxu1  ;;  %v438_v25 = vadd.f32 %v437_v23, %v1601_v55  ;;  %v456_v23 = vadd.f32 %v455_v7, %v1601_v55 }
  0xbc   : > { %v487_v26 = vadd.f32 %v486_v24, %v1603_v56  ;;  %v505_v24 = vadd.f32 %v504_v8, %v1603_v56 }
  0xbd   : > { %v524_v29 = vmax.f32 %v438_v25, 0.0  ;;  %v458_v25 = vadd.f32 %v457_v19, %v1601_v55 }
  0xbe   : > { %v525_v30 = vmax.f32 %v487_v26, 0.0 }
  0xbf   : > { %v550_v32 = vpack.c.bf16 %v524_v29, %v522_v27  ;;  %v460_v27 = vpop.f32.mrf.mxu2  ;;  %v538_v29 = vmax.f32 %v456_v23, 0.0  ;;  %v540_v31 = vmax.f32 %v458_v25, 0.0 }
  0xc0   : > { %v551_v33 = vpack.c.bf16 %v525_v30, %v523_v28  ;;  %v539_v30 = vmax.f32 %v505_v24, 0.0  ;;  %v461_v37 = vadd.f32 %v460_v27, %v1601_v55 }
  0xc1   : > { %712 = vmatmul.bf16.gmra.mxu2 %v550_v32  ;;  %v506_v20 = vpop.f32.mrf.mxu3 }
  0xc2   : > { %761 = vmatmul.bf16.gmra.mxu3 %v551_v33  ;;  %v440_v35 = vpop.f32.mrf.mxu0  ;;  %v507_v26 = vadd.f32 %v506_v20, %v1603_v56  ;;  %v558_v33 = vpack.c.bf16 %v540_v31, %v538_v29 }
  0xc3   : > { %v489_v36 = vpop.f32.mrf.mxu1  ;;  %v441_v38 = vadd.f32 %v440_v35, %v1601_v55 }
  0xc4   : > { %v490_v39 = vadd.f32 %v489_v36, %v1603_v56  ;;  %v541_v32 = vmax.f32 %v507_v26, 0.0 }
  0xc5   : > { %v526_v44 = vmax.f32 %v441_v38, 0.0 }
  0xc6   : > { %v527_v45 = vmax.f32 %v490_v39, 0.0  ;;  %v559_v34 = vpack.c.bf16 %v541_v32, %v539_v30 }
  0xc7   : > { %v462_v35 = vpop.f32.mrf.mxu2 }
  0xc8   : > { %v463_v39 = vadd.f32 %v462_v35, %v1601_v55 }
  0xc9   : > { %v509_v28 = vpop.f32.mrf.mxu3 }
  0xca   : > { %v442_v40 = vpop.f32.mrf.mxu0  ;;  %v510_v38 = vadd.f32 %v509_v28, %v1603_v56 }
  0xcb   : > { %v491_v41 = vpop.f32.mrf.mxu1  ;;  %v443_v42 = vadd.f32 %v442_v40, %v1601_v55 }
  0xcc   : > { %v492_v43 = vadd.f32 %v491_v41, %v1603_v56  ;;  %v1339_v41 = vld [vmem:[%s1730_s5 + $0x8] sm:$0xff] }
  0xcd   : > { %v528_v46 = vmax.f32 %v443_v42, 0.0  ;;  %v542_v42 = vmax.f32 %v461_v37, 0.0  ;;  %890 = vmatpush.bf16.msrb.mxu0 %v1339_v41  ;;  %1407 = vmatpush.bf16.msra.mxu2 %v1339_v41 }
  0xce   : > { %v529_v47 = vmax.f32 %v492_v43, 0.0  ;;  %v543_v43 = vmax.f32 %v510_v38, 0.0 }
  0xcf   : > { %v552_v48 = vpack.c.bf16 %v528_v46, %v526_v44  ;;  %v544_v44 = vmax.f32 %v463_v39, 0.0 }
  0xd0   : > { %v553_v49 = vpack.c.bf16 %v529_v47, %v527_v45 }
  0xd1   : > { %717 = vmatmul.bf16.gmra.mxu2 %v552_v48  ;;  %v511_v36 = vpop.f32.mrf.mxu3  ;;  %v560_v46 = vpack.c.bf16 %v544_v44, %v542_v42  ;;  %v1338_v48 = vld [vmem:[%s1730_s5] sm:$0xff] }
  0xd2   : > { %766 = vmatmul.bf16.gmra.mxu3 %v553_v49  ;;  %v445_v52 = vpop.f32.mrf.mxu0  ;;  %v512_v40 = vadd.f32 %v511_v36, %v1603_v56  ;;  %891 = vmatpush.bf16.msrb.mxu0 %v1338_v48  ;;  %v1664_v49 = vld [vmem:[%s1729_s4] ss:$0 sm:$0xff] }
  0xd3   : > { %v446_v59 = vadd.f32 %v445_v52, %v1601_v55  ;;  %1408 = vmatpush.bf16.msra.mxu2 %v1338_v48 }
  0xd4   : > { %v545_v45 = vmax.f32 %v512_v40, 0.0 }
  0xd5   : > { %v530_v2 = vmax.f32 %v446_v59, 0.0 }
  0xd6   : > { %v561_v47 = vpack.c.bf16 %v545_v45, %v543_v43  ;;  %v1348_v45 = vld [vmem:[%s1732_s7 + $0x10] sm:$0xff] }
  0xda   : > { %v447_v60 = vpop.f32.mrf.mxu0 }
  0xdb   : > { %v448_v63 = vadd.f32 %v447_v60, %v1601_v55 }
  0xdd   : > { %v532_v3 = vmax.f32 %v448_v63, 0.0 }
  0xdf   : > { %v554_v4 = vpack.c.bf16 %v532_v3, %v530_v2 }
  0xe1   : > { %722 = vmatmul.bf16.gmra.mxu2 %v554_v4 }
  0xe2   : > { %771 = vmatmul.bf16.gmra.mxu3 %v555_v5 }
  0xf1   : > { %727 = vmatmul.bf16.gmra.mxu2 %v556_v17 }
  0xf2   : > { %776 = vmatmul.bf16.gmra.mxu3 %v557_v18 }
 0x101   : > { %732 = vmatmul.bf16.gmra.mxu2 %v558_v33  ;;  %v1349_v33 = vld [vmem:[%s1732_s7 + $0x18] sm:$0xff] }
 0x102   : > { %781 = vmatmul.bf16.gmra.mxu3 %v559_v34  ;;  %1022 = vmatpush.bf16.msrb.mxu1 %v1349_v33 }
 0x106   : > { %1023 = vmatpush.bf16.msrb.mxu1 %v1348_v45 }
 0x111   : > { %737 = vmatmul.bf16.gmra.mxu2 %v560_v46 }
 0x112   : > { %786 = vmatmul.bf16.gmra.mxu3 %v561_v47 }
 0x124   : > { %v703_v55 = vpop.f32.mrf.mxu2 }
 0x125   : > { %v752_v56 = vpop.f32.mrf.mxu3  ;;  %v704_v50 = vadd.f32 %v1664_v49, %v703_v55 }
 0x127   : > { %v753_v53 = vadd.f32 %v752_v56, %v704_v50 }
 0x129   : > { %v792_v58 = vmax.f32 %v753_v53, 0.0 }
 0x12c   : > { %v705_v51 = vpop.f32.mrf.mxu2 }
 0x12d   : > { %v754_v52 = vpop.f32.mrf.mxu3  ;;  %v706_v54 = vadd.f32 %v1664_v49, %v705_v51 }
 0x12f   : > { %v755_v57 = vadd.f32 %v754_v52, %v706_v54 }
 0x131   : > { %v793_v59 = vmax.f32 %v755_v57, 0.0  ;;  %v1347_v57 = vld [vmem:[%s1732_s7 + $0x8] sm:$0xff] }
 0x132   : > { %1024 = vmatpush.bf16.msrb.mxu1 %v1347_v57 }
 0x133   : > { %v808_v60 = vpack.c.bf16 %v793_v59, %v792_v58 }
 0x134   : > { %v708_v61 = vpop.f32.mrf.mxu2 }
 0x135   : > { %v757_v62 = vpop.f32.mrf.mxu3  ;;  %892 = vmatmul.bf16.vlgmr.msrb.gmra.mxu0 %v808_v60  ;;  %v709_v63 = vadd.f32 %v1664_v49, %v708_v61 }
 0x137   : > { %v758_v2 = vadd.f32 %v757_v62, %v709_v63 }
 0x139   : > { %v794_v5 = vmax.f32 %v758_v2, 0.0 }
 0x13c   : > { %v710_v0 = vpop.f32.mrf.mxu2 }
 0x13d   : > { %v759_v1 = vpop.f32.mrf.mxu3  ;;  %v711_v3 = vadd.f32 %v1664_v49, %v710_v0 }
 0x13f   : > { %v760_v4 = vadd.f32 %v759_v1, %v711_v3 }
 0x141   : > { %v795_v6 = vmax.f32 %v760_v4, 0.0 }
 0x143   : > { %v809_v7 = vpack.c.bf16 %v795_v6, %v794_v5  ;;  %v1346_v5 = vld [vmem:[%s1732_s7] sm:$0xff] }
 0x144   : > { %v713_v8 = vpop.f32.mrf.mxu2  ;;  %1025 = vmatpush.bf16.msrb.mxu1 %v1346_v5 }
 0x145   : > { %v762_v9 = vpop.f32.mrf.mxu3  ;;  %897 = vmatmul.bf16.gmra.mxu0 %v809_v7  ;;  %v714_v10 = vadd.f32 %v1664_v49, %v713_v8 }
 0x147   : > { %v763_v13 = vadd.f32 %v762_v9, %v714_v10 }
 0x149   : > { %v796_v16 = vmax.f32 %v763_v13, 0.0 }
 0x14c   : > { %v715_v11 = vpop.f32.mrf.mxu2 }
 0x14d   : > { %v764_v12 = vpop.f32.mrf.mxu3  ;;  %v716_v14 = vadd.f32 %v1664_v49, %v715_v11 }
 0x14f   : > { %v765_v15 = vadd.f32 %v764_v12, %v716_v14 }
 0x151   : > { %v797_v17 = vmax.f32 %v765_v15, 0.0 }
 0x153   : > { %v810_v18 = vpack.c.bf16 %v797_v17, %v796_v16  ;;  %v1418_v16 = vld [vmem:[%s1731_s6] ss:$0 sm:$0xff] }
 0x154   : > { %v718_v19 = vpop.f32.mrf.mxu2 }
 0x155   : > { %v767_v20 = vpop.f32.mrf.mxu3  ;;  %902 = vmatmul.bf16.gmra.mxu0 %v810_v18  ;;  %v719_v21 = vadd.f32 %v1664_v49, %v718_v19 }
 0x157   : > { %v768_v24 = vadd.f32 %v767_v20, %v719_v21 }
 0x159   : > { %v798_v27 = vmax.f32 %v768_v24, 0.0 }
 0x15c   : > { %v720_v22 = vpop.f32.mrf.mxu2 }
 0x15d   : > { %v769_v23 = vpop.f32.mrf.mxu3  ;;  %v721_v25 = vadd.f32 %v1664_v49, %v720_v22 }
 0x15f   : > { %v770_v26 = vadd.f32 %v769_v23, %v721_v25 }
 0x161   : > { %v799_v28 = vmax.f32 %v770_v26, 0.0 }
 0x163   : > { %v811_v29 = vpack.c.bf16 %v799_v28, %v798_v27 }
 0x164   : > { %v723_v30 = vpop.f32.mrf.mxu2 }
 0x165   : > { %v772_v31 = vpop.f32.mrf.mxu3  ;;  %907 = vmatmul.bf16.gmra.mxu0 %v811_v29  ;;  %v724_v32 = vadd.f32 %v1664_v49, %v723_v30 }
 0x167   : > { %v773_v36 = vadd.f32 %v772_v31, %v724_v32 }
 0x169   : > { %v800_v39 = vmax.f32 %v773_v36, 0.0 }
 0x16c   : > { %v725_v34 = vpop.f32.mrf.mxu2 }
 0x16d   : > { %v774_v35 = vpop.f32.mrf.mxu3  ;;  %v726_v37 = vadd.f32 %v1664_v49, %v725_v34 }
 0x16f   : > { %v775_v38 = vadd.f32 %v774_v35, %v726_v37 }
 0x171   : > { %v801_v40 = vmax.f32 %v775_v38, 0.0 }
 0x173   : > { %v812_v41 = vpack.c.bf16 %v801_v40, %v800_v39 }
 0x174   : > { %v728_v42 = vpop.f32.mrf.mxu2 }
 0x175   : > { %v777_v43 = vpop.f32.mrf.mxu3  ;;  %912 = vmatmul.bf16.gmra.mxu0 %v812_v41  ;;  %v729_v44 = vadd.f32 %v1664_v49, %v728_v42 }
 0x177   : > { %v778_v48 = vadd.f32 %v777_v43, %v729_v44 }
 0x179   : > { %v802_v50 = vmax.f32 %v778_v48, 0.0 }
 0x17c   : > { %v730_v46 = vpop.f32.mrf.mxu2 }
 0x17d   : > { %v779_v47 = vpop.f32.mrf.mxu3  ;;  %v731_v55 = vadd.f32 %v1664_v49, %v730_v46 }
 0x17f   : > { %v780_v56 = vadd.f32 %v779_v47, %v731_v55 }
 0x181   : > { %v803_v51 = vmax.f32 %v780_v56, 0.0 }
 0x183   : > { %v813_v52 = vpack.c.bf16 %v803_v51, %v802_v50 }
 0x184   : > { %v733_v53 = vpop.f32.mrf.mxu2 }
 0x185   : > { %v782_v54 = vpop.f32.mrf.mxu3  ;;  %917 = vmatmul.bf16.gmra.mxu0 %v813_v52  ;;  %v734_v58 = vadd.f32 %v1664_v49, %v733_v53 }
 0x187   : > { %v783_v61 = vadd.f32 %v782_v54, %v734_v58 }
 0x189   : > { %v804_v0 = vmax.f32 %v783_v61, 0.0 }
 0x18c   : > { %v735_v59 = vpop.f32.mrf.mxu2 }
 0x18d   : > { %v784_v60 = vpop.f32.mrf.mxu3  ;;  %v736_v62 = vadd.f32 %v1664_v49, %v735_v59 }
 0x18f   : > { %v785_v63 = vadd.f32 %v784_v60, %v736_v62 }
 0x191   : > { %v805_v1 = vmax.f32 %v785_v63, 0.0 }
 0x193   : > { %v814_v2 = vpack.c.bf16 %v805_v1, %v804_v0 }
 0x194   : > { %v738_v3 = vpop.f32.mrf.mxu2 }
 0x195   : > { %v787_v4 = vpop.f32.mrf.mxu3  ;;  %922 = vmatmul.bf16.gmra.mxu0 %v814_v2  ;;  %v739_v6 = vadd.f32 %v1664_v49, %v738_v3 }
 0x197   : > { %v788_v8 = vadd.f32 %v787_v4, %v739_v6 }
 0x199   : > { %v806_v12 = vmax.f32 %v788_v8, 0.0 }
 0x19c   : > { %v740_v7 = vpop.f32.mrf.mxu2 }
 0x19d   : > { %v741_v9 = vadd.f32 %v1664_v49, %v740_v7  ;;  %v789_v10 = vpop.f32.mrf.mxu3 }
 0x19f   : > { %v790_v11 = vadd.f32 %v789_v10, %v741_v9  ;;  %v1419_v9 = vld [vmem:[%s1733_s8] ss:$0 sm:$0xff] }
 0x1a1   : > { %v807_v13 = vmax.f32 %v790_v11, 0.0 }
 0x1a3   : > { %v815_v14 = vpack.c.bf16 %v807_v13, %v806_v12 }
 0x1a5   : > { %927 = vmatmul.bf16.vlgmr.msra.gmra.mxu2 %v815_v14 }
 0x1b2   : > { %v893_v15 = vpop.f32.mrf.mxu0 }
 0x1b3   : > { %v894_v17 = vadd.f32 %v1418_v16, %v893_v15 }
 0x1b5   : > { %v933_v20 = vmax.f32 %v894_v17, 0.0 }
 0x1ba   : > { %v895_v18 = vpop.f32.mrf.mxu0 }
 0x1bb   : > { %v896_v19 = vadd.f32 %v1418_v16, %v895_v18 }
 0x1bd   : > { %v934_v21 = vmax.f32 %v896_v19, 0.0 }
 0x1bf   : > { %v949_v22 = vpack.c.bf16 %v934_v21, %v933_v20 }
 0x1c1   : > { %1308 = vmatmul.msk.bf16.vlgmr.msrb.gmra.mxu1 %vm993_vm1, %v949_v22 }
 0x1c2   : > { %v898_v49 = vpop.f32.mrf.mxu0 }
 0x1c3   : > { %v899_v23 = vadd.f32 %v1418_v16, %v898_v49 }
 0x1c5   : > { %v935_v26 = vmax.f32 %v899_v23, 0.0 }
 0x1ca   : > { %v900_v24 = vpop.f32.mrf.mxu0 }
 0x1cb   : > { %v901_v25 = vadd.f32 %v1418_v16, %v900_v24 }
 0x1cd   : > { %v936_v27 = vmax.f32 %v901_v25, 0.0 }
 0x1cf   : > { %v950_v28 = vpack.c.bf16 %v936_v27, %v935_v26 }
 0x1d1   : > { %1309 = vmatmul.msk.bf16.gmra.mxu1 %vm993_vm1, %v950_v28 }
 0x1d2   : > { %v903_v29 = vpop.f32.mrf.mxu0 }
 0x1d3   : > { %v904_v30 = vadd.f32 %v1418_v16, %v903_v29 }
 0x1d5   : > { %v937_v33 = vmax.f32 %v904_v30, 0.0 }
 0x1da   : > { %v905_v31 = vpop.f32.mrf.mxu0 }
 0x1db   : > { %v906_v32 = vadd.f32 %v1418_v16, %v905_v31 }
 0x1dd   : > { %v938_v34 = vmax.f32 %v906_v32, 0.0 }
 0x1df   : > { %v951_v35 = vpack.c.bf16 %v938_v34, %v937_v33 }
 0x1e1   : > { %1310 = vmatmul.msk.bf16.gmra.mxu1 %vm993_vm1, %v951_v35 }
 0x1e2   : > { %v908_v36 = vpop.f32.mrf.mxu0 }
 0x1e3   : > { %v909_v37 = vadd.f32 %v1418_v16, %v908_v36 }
 0x1e5   : > { %v939_v40 = vmax.f32 %v909_v37, 0.0 }
 0x1ea   : > { %v910_v38 = vpop.f32.mrf.mxu0 }
 0x1eb   : > { %v911_v39 = vadd.f32 %v1418_v16, %v910_v38 }
 0x1ed   : > { %v940_v41 = vmax.f32 %v911_v39, 0.0 }
 0x1ef   : > { %v952_v42 = vpack.c.bf16 %v940_v41, %v939_v40 }
 0x1f1   : > { %1311 = vmatmul.msk.bf16.gmra.mxu1 %vm993_vm1, %v952_v42 }
 0x1f2   : > { %v913_v43 = vpop.f32.mrf.mxu0 }
 0x1f3   : > { %v914_v44 = vadd.f32 %v1418_v16, %v913_v43 }
 0x1f5   : > { %v941_v47 = vmax.f32 %v914_v44, 0.0 }
 0x1fa   : > { %v915_v45 = vpop.f32.mrf.mxu0 }
 0x1fb   : > { %v916_v46 = vadd.f32 %v1418_v16, %v915_v45 }
 0x1fd   : > { %v942_v48 = vmax.f32 %v916_v46, 0.0 }
 0x1ff   : > { %v953_v55 = vpack.c.bf16 %v942_v48, %v941_v47 }
 0x201   : > { %1312 = vmatmul.msk.bf16.gmra.mxu1 %vm993_vm1, %v953_v55 }
 0x202   : > { %v918_v56 = vpop.f32.mrf.mxu0 }
 0x203   : > { %v919_v50 = vadd.f32 %v1418_v16, %v918_v56 }
 0x205   : > { %v943_v53 = vmax.f32 %v919_v50, 0.0 }
 0x20a   : > { %v920_v51 = vpop.f32.mrf.mxu0 }
 0x20b   : > { %v921_v52 = vadd.f32 %v1418_v16, %v920_v51 }
 0x20d   : > { %v944_v54 = vmax.f32 %v921_v52, 0.0 }
 0x20f   : > { %v954_v57 = vpack.c.bf16 %v944_v54, %v943_v53 }
 0x211   : > { %1313 = vmatmul.msk.bf16.gmra.mxu1 %vm993_vm1, %v954_v57 }
 0x212   : > { %v923_v58 = vpop.f32.mrf.mxu0 }
 0x213   : > { %v924_v59 = vadd.f32 %v1418_v16, %v923_v58 }
 0x215   : > { %v945_v62 = vmax.f32 %v924_v59, 0.0 }
 0x21a   : > { %v925_v60 = vpop.f32.mrf.mxu0 }
 0x21b   : > { %v926_v61 = vadd.f32 %v1418_v16, %v925_v60 }
 0x21d   : > { %v946_v63 = vmax.f32 %v926_v61, 0.0 }
 0x21f   : > { %v955_v0 = vpack.c.bf16 %v946_v63, %v945_v62 }
 0x221   : > { %1314 = vmatmul.msk.bf16.gmra.mxu1 %vm993_vm1, %v955_v0 }
 0x228   : > { %v928_v1 = vpop.f32.mrf.mxu2 }
 0x229   : > { %v929_v2 = vadd.f32 %v1418_v16, %v928_v1 }
 0x22b   : > { %v947_v5 = vmax.f32 %v929_v2, 0.0 }
 0x230   : > { %v930_v3 = vpop.f32.mrf.mxu2 }
 0x231   : > { %v931_v4 = vadd.f32 %v1418_v16, %v930_v3 }
 0x233   : > { %v948_v6 = vmax.f32 %v931_v4, 0.0 }
 0x235   : > { %v956_v7 = vpack.c.bf16 %v948_v6, %v947_v5 }
 0x237   : > { %1315 = vmatmul.msk.bf16.gmra.mxu1 %vm993_vm1, %v956_v7 }
 0x23e   : > { %v1027_v8 = vpop.f32.mrf.mxu1 }
 0x23f   : > { %v1028_v11 = vadd.f32 %v1419_v9, %v1027_v8 }
 0x246   : > { %v1029_v10 = vpop.f32.mrf.mxu1 }
 0x247   : > { %v1030_v12 = vadd.f32 %v1419_v9, %v1029_v10 }
 0x249   : > { %v1353_v13 = vpack.c.bf16 %v1030_v12, %v1028_v11 }
 0x24b   : > { %1354 = vst [vmem:[%s1712_s23] sm:$0xff] %v1353_v13  }
 0x24e   : > { %v1032_v14 = vpop.f32.mrf.mxu1 }
 0x24f   : > { %v1033_v16 = vadd.f32 %v1419_v9, %v1032_v14 }
 0x256   : > { %v1034_v15 = vpop.f32.mrf.mxu1 }
 0x257   : > { %v1035_v17 = vadd.f32 %v1419_v9, %v1034_v15 }
 0x259   : > { %v1358_v18 = vpack.c.bf16 %v1035_v17, %v1033_v16 }
 0x25b   : > { %1390 = vst [vmem:[%s1712_s23 + $0x8] sm:$0xff] %v1358_v18  }
 0x25e   : > { %v1037_v19 = vpop.f32.mrf.mxu1 }
 0x25f   : > { %v1038_v21 = vadd.f32 %v1419_v9, %v1037_v19 }
 0x266   : > { %v1039_v20 = vpop.f32.mrf.mxu1 }
 0x267   : > { %v1040_v22 = vadd.f32 %v1419_v9, %v1039_v20 }
 0x269   : > { %v1363_v49 = vpack.c.bf16 %v1040_v22, %v1038_v21 }
 0x26b   : > { %1391 = vst [vmem:[%s1712_s23 + $0x10] sm:$0xff] %v1363_v49  }
 0x26e   : > { %v1042_v23 = vpop.f32.mrf.mxu1 }
 0x26f   : > { %v1043_v25 = vadd.f32 %v1419_v9, %v1042_v23 }
 0x276   : > { %v1044_v24 = vpop.f32.mrf.mxu1 }
 0x277   : > { %v1045_v26 = vadd.f32 %v1419_v9, %v1044_v24 }
 0x279   : > { %v1368_v27 = vpack.c.bf16 %v1045_v26, %v1043_v25 }
 0x27b   : > { %1392 = vst [vmem:[%s1712_s23 + $0x18] sm:$0xff] %v1368_v27  }
 0x27e   : > { %v1047_v28 = vpop.f32.mrf.mxu1 }
 0x27f   : > { %v1048_v30 = vadd.f32 %v1419_v9, %v1047_v28 }
 0x286   : > { %v1049_v29 = vpop.f32.mrf.mxu1 }
 0x287   : > { %v1050_v31 = vadd.f32 %v1419_v9, %v1049_v29 }
 0x289   : > { %v1373_v32 = vpack.c.bf16 %v1050_v31, %v1048_v30 }
 0x28b   : > { %1393 = vst [vmem:[%s1712_s23 + $0x20] sm:$0xff] %v1373_v32  }
 0x28e   : > { %v1052_v33 = vpop.f32.mrf.mxu1 }
 0x28f   : > { %v1053_v35 = vadd.f32 %v1419_v9, %v1052_v33 }
 0x296   : > { %v1054_v34 = vpop.f32.mrf.mxu1 }
 0x297   : > { %v1055_v36 = vadd.f32 %v1419_v9, %v1054_v34 }
 0x299   : > { %v1378_v37 = vpack.c.bf16 %v1055_v36, %v1053_v35 }
 0x29b   : > { %1394 = vst [vmem:[%s1712_s23 + $0x28] sm:$0xff] %v1378_v37  }
 0x29e   : > { %v1057_v38 = vpop.f32.mrf.mxu1 }
 0x29f   : > { %v1058_v40 = vadd.f32 %v1419_v9, %v1057_v38 }
 0x2a6   : > { %v1059_v39 = vpop.f32.mrf.mxu1 }
 0x2a7   : > { %v1060_v41 = vadd.f32 %v1419_v9, %v1059_v39 }
 0x2a9   : > { %v1383_v42 = vpack.c.bf16 %v1060_v41, %v1058_v40 }
 0x2ab   : > { %1395 = vst [vmem:[%s1712_s23 + $0x30] sm:$0xff] %v1383_v42  }
 0x2b4   : > { %v1062_v43 = vpop.f32.mrf.mxu1 }
 0x2b5   : > { %v1063_v45 = vadd.f32 %v1419_v9, %v1062_v43 }
 0x2bc   : > { %v1064_v44 = vpop.f32.mrf.mxu1 }
 0x2bd   : > { %v1065_v46 = vadd.f32 %v1419_v9, %v1064_v44 }
 0x2bf   : > { %v1388_v47 = vpack.c.bf16 %v1065_v46, %v1063_v45 }
 0x2c1   : > { %1396 = vst [vmem:[%s1712_s23 + $0x38] sm:$0xff] %v1388_v47  }
 0x2c2 PF: > { %s19_s30 = sadd.s32 1, %s1426_s30  }
 0x2c3   : > { %p16_p4 = scmp.ge.s32.totalorder %s19_s30, 4  }
 0x2c5   :  { %18 = sbr.rel (!%p16_p4) target bundleno = 1 (0x1), region = 86 }

</bundles_post_ra>
